<compile_context>
chip_gen: v6e
topology: v6e:2x2x1
jax: 0.10.0
libtpu: 0.0.40
codegen_flags: <defaults>
</compile_context>

<pallas_src>
import math

import jax
import jax.numpy as jnp
from jax.experimental import pallas as pl
from jax.experimental.pallas import tpu as pltpu


def _make_cat_dma_kernel(flat_sizes, chunk_bounds):
    """Kernel that DMA-copies each (flattened) input into its output column slab.

    flat_sizes:   per-input flattened feature size C_i * H * W.
    chunk_bounds: list of (batch_start, batch_size) chunks; all chunks of all
                  inputs are started before any wait so they overlap.
    """
    offsets = []
    off = 0
    for f in flat_sizes:
        offsets.append(off)
        off += f
    num_inputs = len(flat_sizes)
    num_chunks = len(chunk_bounds)

    def kernel(*refs):
        in_refs = refs[:num_inputs]
        out_ref = refs[num_inputs]
        sem = refs[num_inputs + 1]  # DMA sems, shape (num_inputs, num_chunks)

        copies = []
        for i, (f, o) in enumerate(zip(flat_sizes, offsets)):
            for c, (b0, bs) in enumerate(chunk_bounds):
                # Source: contiguous (bs, f) slab of input i.
                # Dest:   strided (bs, f) column slab of the flat output.
                cp = pltpu.make_async_copy(
                    in_refs[i].at[b0:b0 + bs, :],
                    out_ref.at[b0:b0 + bs, o:o + f],
                    sem.at[i, c],
                )
                cp.start()
                copies.append(cp)
        # Start everything first, then wait -> all copies in flight together.
        for cp in copies:
            cp.wait()

    return kernel


def cat_channels(tensors):
    """Concatenate (N, C_i, ...) arrays along dim=1 with a single-shot Pallas DMA kernel."""
    tensors = list(tensors)
    assert len(tensors) >= 1
    lead = int(tensors[0].shape[0])
    rest = tuple(tensors[0].shape[2:])
    dtype = tensors[0].dtype
    for t in tensors:
        assert t.ndim >= 2
        assert t.shape[0] == lead and tuple(t.shape[2:]) == rest
        assert t.dtype == dtype

    channels = [int(t.shape[1]) for t in tensors]
    spatial = math.prod(rest) if rest else 1
    flat_sizes = [c * spatial for c in channels]
    flat_total = sum(flat_sizes)
    out_shape_final = (lead, sum(channels)) + rest

    # Flatten trailing dims so every DMA is long contiguous runs.
    flats = [t.reshape(lead, f) for t, f in zip(tensors, flat_sizes)]

    # For very large per-input slabs, split into a couple of batch chunks so
    # more DMAs are outstanding (helps saturate v7x's HBM). Small slabs: 1 DMA.
    itemsize = jnp.dtype(dtype).itemsize
    big_slab = max(flat_sizes) * lead * itemsize >= (4 << 20)
    num_chunks = 2 if (big_slab and lead >= 2) else 1
    chunk_bounds = []
    base, remn, start = lead // num_chunks, lead % num_chunks, 0
    for c in range(num_chunks):
        size = base + (1 if c < remn else 0)
        if size > 0:
            chunk_bounds.append((start, size))
        start += size

    kernel = _make_cat_dma_kernel(flat_sizes, chunk_bounds)

    total_bytes = 2 * sum(int(t.size) * itemsize for t in tensors)  # read + write

    out_flat = pl.pallas_call(
        kernel,
        out_shape=jax.ShapeDtypeStruct((lead, flat_total), dtype),
        # Everything stays in HBM; the kernel moves data with explicit DMAs.
        in_specs=[pl.BlockSpec(memory_space=pl.ANY) for _ in flats],
        out_specs=pl.BlockSpec(memory_space=pl.ANY),
        scratch_shapes=[pltpu.SemaphoreType.DMA((len(flats), len(chunk_bounds)))],
        cost_estimate=pl.CostEstimate(
            flops=0, transcendentals=0, bytes_accessed=total_bytes),
    )(*flats)

    return out_flat.reshape(out_shape_final)


if __name__ == "__main__":
    key = jax.random.PRNGKey(0)
    k1, k2, k3, k4, k5 = jax.random.split(key, 5)

    # Small NCHW inputs with different channel counts (the only dim allowed to differ).
    x1 = jax.random.normal(k1, (2, 4, 16, 16), dtype=jnp.float32)
    x2 = jax.random.normal(k2, (2, 6, 16, 16), dtype=jnp.float32)
    x3 = jax.random.normal(k3, (2, 2, 16, 16), dtype=jnp.float32)

    out = cat_channels([x1, x2, x3])
    out = jax.block_until_ready(out)

    ref = jnp.concatenate([x1, x2, x3], axis=1)
    assert out.shape == (2, 12, 16, 16)
    assert jnp.array_equal(out, ref)

    # Also exercise the 2-D (N, C) path (trailing dims empty -> flatten is identity).
    y1 = jax.random.normal(k4, (2, 32), dtype=jnp.float32)
    y2 = jax.random.normal(k5, (2, 48), dtype=jnp.float32)
    out2 = jax.block_until_ready(cat_channels([y1, y2]))
    assert jnp.array_equal(out2, jnp.concatenate([y1, y2], axis=1))

    print("KERNEL_OK")
</pallas_src>

<mosaic_0001>
module attributes {stable_mosaic.version = 11 : i64} {
  func.func @kernel(%arg0: memref<2x1024xf32, #tpu.memory_space<any>>, %arg1: memref<2x1536xf32, #tpu.memory_space<any>>, %arg2: memref<2x512xf32, #tpu.memory_space<any>>, %arg3: memref<2x3072xf32, #tpu.memory_space<any>>, %arg4: memref<3x1x!tpu.dma_semaphore, #tpu.memory_space<semaphore_mem>>) attributes {dimension_semantics = [], scalar_prefetch = 0 : i64, scratch_operands = 1 : i64, tpu.core_type = #tpu.core_type<tc>} {
    %c0_i32 = arith.constant 0 : i32
    %c0_i32_0 = arith.constant 0 : i32
    %c0_i32_1 = arith.constant 0 : i32
    %c0_i32_2 = arith.constant 0 : i32
    %0 = tpu.memref_slice %arg0[%c0_i32_1, %c0_i32_2] : memref<2x1024xf32, #tpu.memory_space<any>> -> memref<2x1024xf32, #tpu.memory_space<any>>
    %c0_i32_3 = arith.constant 0 : i32
    %c0_i32_4 = arith.constant 0 : i32
    %1 = tpu.memref_slice %arg3[%c0_i32_3, %c0_i32_4] : memref<2x3072xf32, #tpu.memory_space<any>> -> memref<2x1024xf32, #tpu.memory_space<any>>
    %2 = tpu.memref_slice %arg4[%c0_i32, %c0_i32_0] : memref<3x1x!tpu.dma_semaphore, #tpu.memory_space<semaphore_mem>> -> memref<1x1x!tpu.dma_semaphore, #tpu.memory_space<semaphore_mem>>
    %3 = tpu.memref_squeeze %2 : memref<1x1x!tpu.dma_semaphore, #tpu.memory_space<semaphore_mem>> -> memref<!tpu.dma_semaphore, #tpu.memory_space<semaphore_mem>>
    tpu.enqueue_dma source(%0 : memref<2x1024xf32, #tpu.memory_space<any>>) target(%1 : memref<2x1024xf32, #tpu.memory_space<any>>) target_semaphore(%3 : memref<!tpu.dma_semaphore, #tpu.memory_space<semaphore_mem>>)
    %c1_i32 = arith.constant 1 : i32
    %c0_i32_5 = arith.constant 0 : i32
    %c0_i32_6 = arith.constant 0 : i32
    %c0_i32_7 = arith.constant 0 : i32
    %4 = tpu.memref_slice %arg1[%c0_i32_6, %c0_i32_7] : memref<2x1536xf32, #tpu.memory_space<any>> -> memref<2x1536xf32, #tpu.memory_space<any>>
    %c0_i32_8 = arith.constant 0 : i32
    %c1024_i32 = arith.constant 1024 : i32
    %5 = tpu.memref_slice %arg3[%c0_i32_8, %c1024_i32] : memref<2x3072xf32, #tpu.memory_space<any>> -> memref<2x1536xf32, #tpu.memory_space<any>>
    %6 = tpu.memref_slice %arg4[%c1_i32, %c0_i32_5] : memref<3x1x!tpu.dma_semaphore, #tpu.memory_space<semaphore_mem>> -> memref<1x1x!tpu.dma_semaphore, #tpu.memory_space<semaphore_mem>>
    %7 = tpu.memref_squeeze %6 : memref<1x1x!tpu.dma_semaphore, #tpu.memory_space<semaphore_mem>> -> memref<!tpu.dma_semaphore, #tpu.memory_space<semaphore_mem>>
    tpu.enqueue_dma source(%4 : memref<2x1536xf32, #tpu.memory_space<any>>) target(%5 : memref<2x1536xf32, #tpu.memory_space<any>>) target_semaphore(%7 : memref<!tpu.dma_semaphore, #tpu.memory_space<semaphore_mem>>)
    %c2_i32 = arith.constant 2 : i32
    %c0_i32_9 = arith.constant 0 : i32
    %c0_i32_10 = arith.constant 0 : i32
    %c0_i32_11 = arith.constant 0 : i32
    %8 = tpu.memref_slice %arg2[%c0_i32_10, %c0_i32_11] : memref<2x512xf32, #tpu.memory_space<any>> -> memref<2x512xf32, #tpu.memory_space<any>>
    %c0_i32_12 = arith.constant 0 : i32
    %c2560_i32 = arith.constant 2560 : i32
    %9 = tpu.memref_slice %arg3[%c0_i32_12, %c2560_i32] : memref<2x3072xf32, #tpu.memory_space<any>> -> memref<2x512xf32, #tpu.memory_space<any>>
    %10 = tpu.memref_slice %arg4[%c2_i32, %c0_i32_9] : memref<3x1x!tpu.dma_semaphore, #tpu.memory_space<semaphore_mem>> -> memref<1x1x!tpu.dma_semaphore, #tpu.memory_space<semaphore_mem>>
    %11 = tpu.memref_squeeze %10 : memref<1x1x!tpu.dma_semaphore, #tpu.memory_space<semaphore_mem>> -> memref<!tpu.dma_semaphore, #tpu.memory_space<semaphore_mem>>
    tpu.enqueue_dma source(%8 : memref<2x512xf32, #tpu.memory_space<any>>) target(%9 : memref<2x512xf32, #tpu.memory_space<any>>) target_semaphore(%11 : memref<!tpu.dma_semaphore, #tpu.memory_space<semaphore_mem>>)
    %c0_i32_13 = arith.constant 0 : i32
    %c0_i32_14 = arith.constant 0 : i32
    %c0_i32_15 = arith.constant 0 : i32
    %c0_i32_16 = arith.constant 0 : i32
    %12 = tpu.memref_slice %arg0[%c0_i32_15, %c0_i32_16] : memref<2x1024xf32, #tpu.memory_space<any>> -> memref<2x1024xf32, #tpu.memory_space<any>>
    %c0_i32_17 = arith.constant 0 : i32
    %c0_i32_18 = arith.constant 0 : i32
    %13 = tpu.memref_slice %arg3[%c0_i32_17, %c0_i32_18] : memref<2x3072xf32, #tpu.memory_space<any>> -> memref<2x1024xf32, #tpu.memory_space<any>>
    %14 = tpu.memref_slice %arg4[%c0_i32_13, %c0_i32_14] : memref<3x1x!tpu.dma_semaphore, #tpu.memory_space<semaphore_mem>> -> memref<1x1x!tpu.dma_semaphore, #tpu.memory_space<semaphore_mem>>
    %15 = tpu.memref_squeeze %14 : memref<1x1x!tpu.dma_semaphore, #tpu.memory_space<semaphore_mem>> -> memref<!tpu.dma_semaphore, #tpu.memory_space<semaphore_mem>>
    tpu.wait_dma2 semaphore(%15 : memref<!tpu.dma_semaphore, #tpu.memory_space<semaphore_mem>>) src(%12 : memref<2x1024xf32, #tpu.memory_space<any>>) dst(%13 : memref<2x1024xf32, #tpu.memory_space<any>>)
    %c1_i32_19 = arith.constant 1 : i32
    %c0_i32_20 = arith.constant 0 : i32
    %c0_i32_21 = arith.constant 0 : i32
    %c0_i32_22 = arith.constant 0 : i32
    %16 = tpu.memref_slice %arg1[%c0_i32_21, %c0_i32_22] : memref<2x1536xf32, #tpu.memory_space<any>> -> memref<2x1536xf32, #tpu.memory_space<any>>
    %c0_i32_23 = arith.constant 0 : i32
    %c1024_i32_24 = arith.constant 1024 : i32
    %17 = tpu.memref_slice %arg3[%c0_i32_23, %c1024_i32_24] : memref<2x3072xf32, #tpu.memory_space<any>> -> memref<2x1536xf32, #tpu.memory_space<any>>
    %18 = tpu.memref_slice %arg4[%c1_i32_19, %c0_i32_20] : memref<3x1x!tpu.dma_semaphore, #tpu.memory_space<semaphore_mem>> -> memref<1x1x!tpu.dma_semaphore, #tpu.memory_space<semaphore_mem>>
    %19 = tpu.memref_squeeze %18 : memref<1x1x!tpu.dma_semaphore, #tpu.memory_space<semaphore_mem>> -> memref<!tpu.dma_semaphore, #tpu.memory_space<semaphore_mem>>
    tpu.wait_dma2 semaphore(%19 : memref<!tpu.dma_semaphore, #tpu.memory_space<semaphore_mem>>) src(%16 : memref<2x1536xf32, #tpu.memory_space<any>>) dst(%17 : memref<2x1536xf32, #tpu.memory_space<any>>)
    %c2_i32_25 = arith.constant 2 : i32
    %c0_i32_26 = arith.constant 0 : i32
    %c0_i32_27 = arith.constant 0 : i32
    %c0_i32_28 = arith.constant 0 : i32
    %20 = tpu.memref_slice %arg2[%c0_i32_27, %c0_i32_28] : memref<2x512xf32, #tpu.memory_space<any>> -> memref<2x512xf32, #tpu.memory_space<any>>
    %c0_i32_29 = arith.constant 0 : i32
    %c2560_i32_30 = arith.constant 2560 : i32
    %21 = tpu.memref_slice %arg3[%c0_i32_29, %c2560_i32_30] : memref<2x3072xf32, #tpu.memory_space<any>> -> memref<2x512xf32, #tpu.memory_space<any>>
    %22 = tpu.memref_slice %arg4[%c2_i32_25, %c0_i32_26] : memref<3x1x!tpu.dma_semaphore, #tpu.memory_space<semaphore_mem>> -> memref<1x1x!tpu.dma_semaphore, #tpu.memory_space<semaphore_mem>>
    %23 = tpu.memref_squeeze %22 : memref<1x1x!tpu.dma_semaphore, #tpu.memory_space<semaphore_mem>> -> memref<!tpu.dma_semaphore, #tpu.memory_space<semaphore_mem>>
    tpu.wait_dma2 semaphore(%23 : memref<!tpu.dma_semaphore, #tpu.memory_space<semaphore_mem>>) src(%20 : memref<2x512xf32, #tpu.memory_space<any>>) dst(%21 : memref<2x512xf32, #tpu.memory_space<any>>)
    return
  }
}

</mosaic_0001>

<bundles_post_ra>
// kernel: tpu_custom_call.1
= control target key start
LH: loop header
LB: loop body
LE: loop exit
PB: predicated region body
PF: predicated region fallthrough
CT: control target
= control target key end

     0   :  { %s77_s15 = smov [#allocation2]   ;;  %s78_s16 = smov 131072   ;;  %s120_s0 = inlined_call_operand.hbm [shape: f32[2,1024], index: 0, kind: input, shape index: {}]   ;;  %s121_s3 = inlined_call_operand.hbm [shape: f32[2,3072], index: 3, kind: output, shape index: {}]   ;;  %s122_s1 = inlined_call_operand.hbm [shape: f32[2,1536], index: 1, kind: input, shape index: {}]   ;;  %s123_s2 = inlined_call_operand.hbm [shape: f32[2,512], index: 2, kind: input, shape index: {}]  }
   0x1   :  { %s15_s14 = scalar_lea.hbm %s121_s3, 256  ;;  %s79_s17 = smov 0  }
   0x2   :  { %14 = dma.general %s120_s0, 256, %s121_s3, %s77_s15, %s78_s16, [#allocation4], %s79_s17, 0  }
   0x3   :  { %s24_s24 = scalar_lea.hbm %s121_s3, 640  ;;  %s80_s25 = smov [#allocation2 + $0x1]  }
   0x4   :  { %23 = dma.general %s122_s1, 384, %s15_s14, %s80_s25, %s78_s16, [#allocation6], %s79_s17, 0  }
   0x5   :  { %s81_s28 = smov [#allocation2 + $0x2]  }
   0x6   :  { %32 = dma.general %s123_s2, 128, %s24_s24, %s81_s28, %s78_s16, [#allocation8], %s79_s17, 0  }
   0x7   :  { %71 = dma.done.wait [#allocation2], 256 }
   0x8   :  { %72 = vsyncadd [#allocation2], 4294967040 }
   0x9   :  { %73 = dma.done.wait [#allocation2 + $0x1], 384 }
   0xa   :  { %74 = vsyncadd [#allocation2 + $0x1], 4294966912 }
   0xb   :  { %75 = dma.done.wait [#allocation2 + $0x2], 128 }
   0xc   :  { %76 = vsyncadd [#allocation2 + $0x2], 4294967168 }
   0xd   :  { %43 = vsyncmov [#allocation2] }
  0x10   :  { %s44_s0 = vpop.sfrf %43 }
  0x11   :  { %p63_p0 = scmp.ne.s32.totalorder %s44_s0, 0 }
  0x13   :  { %48 = shalt.err (%p63_p0)  }
  0x14   :  { %50 = vsyncmov [#allocation2 + $0x1] }
  0x17   :  { %s51_s3 = vpop.sfrf %50 }
  0x18   :  { %p64_p1 = scmp.ne.s32.totalorder %s51_s3, 0 }
  0x1a   :  { %55 = shalt.err (%p64_p1)  }
  0x1b   :  { %57 = vsyncmov [#allocation2 + $0x2] }
  0x1e   :  { %s58_s1 = vpop.sfrf %57 }
  0x1f   :  { %p65_p2 = scmp.ne.s32.totalorder %s58_s1, 0 }
  0x21   :  { %62 = shalt.err (%p65_p2)  }

</bundles_post_ra>
